<compile_context>
chip_gen: v7x
topology: tpu7x:2x2x1
jax: 0.10.0
libtpu: 0.0.40
codegen_flags: <defaults>
</compile_context>

<pallas_src>
import functools

import jax
import jax.numpy as jnp
from jax.experimental import pallas as pl
from jax.experimental.pallas import tpu as pltpu

EPS = 1e-5          # PyTorch InstanceNorm2d default
NEG_SLOPE = 0.01    # PyTorch LeakyReLU default


def _im2col_into(a, slab_ref, dw_masks, H, W, K, pad):
    """Build the im2col slab: slab[(kh*K+kw)*C + ci, h*W+w] = a[ci, (h+kh-pad)*W + (w+kw-pad)]
    (zero outside the frame).  `a` is (C, H*W) with H*W on the lane axis, so every shift is a
    lane-axis slice + zero-fill concat; the kw row-wrap is killed with a (1, H*W) mask."""
    C, HW = a.shape
    t = 0
    for kh in range(K):
        for kw in range(K):
            dh, dw = kh - pad, kw - pad
            off = dh * W + dw
            if off > 0:
                col = jnp.concatenate([a[:, off:], jnp.zeros((C, off), a.dtype)], axis=1)
            elif off < 0:
                col = jnp.concatenate([jnp.zeros((C, -off), a.dtype), a[:, :HW + off]], axis=1)
            else:
                col = a
            if dw != 0:
                # Flattened shift wraps across rows; zero the columns whose w+dw is OOB.
                col = jnp.where(dw_masks[dw], col, 0.0)
            slab_ref[pl.ds(t * C, C), :] = col.astype(slab_ref.dtype)
            t += 1


def _conv_block_kernel(x_ref, w1_ref, w2_ref, o_ref, slab1_ref, slab2_ref, *, H, W, K, pad):
    """One grid step = one batch sample; both (conv -> IN -> LeakyReLU -> Dropout p=0) stages.

    x_ref:     (1, Cin, H*W)            input block (channels-major, lane-dense)
    w1_ref:    (Cmid, K*K*Cin)          conv1 weight, contraction-major
    w2_ref:    (Cout, K*K*Cmid)         conv2 weight, contraction-major
    o_ref:     (1, Cout, H*W)           output block (lane-dense store)
    slab*_ref: VMEM im2col scratch (K*K*C, H*W), fully overwritten every step
    """
    HW = H * W
    inv_hw = 1.0 / HW

    # kw-tap validity masks (shape (1, HW)), computed once and shared by both stages.
    wpos = jax.lax.broadcasted_iota(jnp.int32, (1, HW), 1) % W
    dw_masks = {d: (wpos + d >= 0) & (wpos + d < W)
                for d in range(-pad, K - pad) if d != 0}

    def stage(a, w_ref, slab_ref):
        _im2col_into(a, slab_ref, dw_masks, H, W, K, pad)
        # Single deep matmul: (Co, K*K*C) @ (K*K*C, HW) -> (Co, HW), f32 accumulation.
        y = jnp.dot(w_ref[...], slab_ref[...], preferred_element_type=jnp.float32)
        # InstanceNorm2d (biased var, eps=1e-5, no affine), single pass over lanes, f32.
        mean = jnp.sum(y, axis=1, keepdims=True) * inv_hw
        var = jnp.sum(y * y, axis=1, keepdims=True) * inv_hw - mean * mean
        var = jnp.maximum(var, 0.0)            # guard E[x^2]-E[x]^2 cancellation
        y = (y - mean) * jax.lax.rsqrt(var + EPS)
        # LeakyReLU(0.01); Dropout2d(p=0.0) is an exact identity.
        return jnp.where(y >= 0, y, NEG_SLOPE * y)

    y1 = stage(x_ref[0], w1_ref, slab1_ref)    # (Cmid, HW), stays in VMEM/vregs
    y2 = stage(y1, w2_ref, slab2_ref)          # (Cout, HW)
    o_ref[0] = y2.astype(o_ref.dtype)


def _vmem_limit_bytes(Cin, Cmid, Cout, HW, K, compute_itemsize):
    f32 = 4
    kk = K * K
    io = 2 * (Cin + Cout) * HW * f32                                   # double-buffered I/O blocks
    weights = 2 * (Cmid * kk * Cin + Cout * kk * Cmid) * compute_itemsize
    slabs = (kk * Cin + kk * Cmid) * HW * compute_itemsize             # im2col scratch
    live = 6 * max(Cin, Cmid, Cout) * HW * f32                         # y, y*y, shifted cols, ...
    need = io + weights + slabs + live
    return int(min(max(2 * need, 8 * 1024 * 1024), 100 * 1024 * 1024))


def conv_block(x_nchw, w1_oihw, w2_oihw, *, padding=1, compute_dtype=jnp.float32):
    """ConvBlock.forward. x_nchw: (B, Cin, H, W) -> (B, Cout, H, W). Weights in PyTorch OIHW."""
    B, Cin, H, W = x_nchw.shape
    Cmid, _, K, _ = w1_oihw.shape
    Cout = w2_oihw.shape[0]
    assert 2 * padding == K - 1, "kernel assumes 'same' convolution (output == input size)"
    HW = H * W

    # Free HBM reshapes only (no transposes): the kernel is channels-major / NCHW-native.
    x2 = x_nchw.reshape(B, Cin, HW)
    # Weights -> (Cout, K*K*Cin), column order (kh, kw, ci) matching the im2col slab rows.
    wmat1 = jnp.transpose(w1_oihw, (0, 2, 3, 1)).reshape(Cmid, K * K * Cin).astype(compute_dtype)
    wmat2 = jnp.transpose(w2_oihw, (0, 2, 3, 1)).reshape(Cout, K * K * Cmid).astype(compute_dtype)

    kernel = functools.partial(_conv_block_kernel, H=H, W=W, K=K, pad=padding)
    itemsize = jnp.dtype(compute_dtype).itemsize

    out = pl.pallas_call(
        kernel,
        out_shape=jax.ShapeDtypeStruct((B, Cout, HW), x_nchw.dtype),
        grid_spec=pltpu.PrefetchScalarGridSpec(
            num_scalar_prefetch=0,
            grid=(B,),
            in_specs=[
                pl.BlockSpec((1, Cin, HW), lambda b: (b, 0, 0)),
                # Grid-invariant index_map: weights DMA'd once and kept resident in VMEM.
                pl.BlockSpec((Cmid, K * K * Cin), lambda b: (0, 0)),
                pl.BlockSpec((Cout, K * K * Cmid), lambda b: (0, 0)),
            ],
            out_specs=pl.BlockSpec((1, Cout, HW), lambda b: (b, 0, 0)),
            scratch_shapes=[
                pltpu.VMEM((K * K * Cin, HW), compute_dtype),   # im2col slab, stage 1
                pltpu.VMEM((K * K * Cmid, HW), compute_dtype),  # im2col slab, stage 2
            ],
        ),
        compiler_params=pltpu.CompilerParams(
            dimension_semantics=("parallel",),   # independent samples; v7x megacore split
            vmem_limit_bytes=_vmem_limit_bytes(Cin, Cmid, Cout, HW, K, itemsize),
        ),
    )(x2, wmat1, wmat2)
    return out.reshape(B, Cout, H, W)


# ---------------- plain-JAX reference for validation ----------------
def _ref_conv_norm_act(x_nchw, w_oihw):
    y = jax.lax.conv_general_dilated(
        x_nchw, w_oihw, window_strides=(1, 1), padding="SAME",
        dimension_numbers=("NCHW", "OIHW", "NCHW"))
    mean = jnp.mean(y, axis=(2, 3), keepdims=True)
    var = jnp.mean((y - mean) ** 2, axis=(2, 3), keepdims=True)
    y = (y - mean) * jax.lax.rsqrt(var + EPS)
    return jnp.where(y >= 0, y, NEG_SLOPE * y)


def _ref_conv_block(x_nchw, w1_oihw, w2_oihw):
    return _ref_conv_norm_act(_ref_conv_norm_act(x_nchw, w1_oihw), w2_oihw)


if __name__ == "__main__":
    B, Cin, Cout, H, W, K = 2, 4, 8, 16, 16, 3
    Cmid = Cout  # mid_channels defaults to out_channels

    key = jax.random.PRNGKey(0)
    kx, k1, k2 = jax.random.split(key, 3)

    x = jax.random.normal(kx, (B, Cin, H, W), dtype=jnp.float32)
    # PyTorch Conv2d weight shape (out, in, K, K); deterministic kaiming-ish init.
    w1_oihw = jax.random.normal(k1, (Cmid, Cin, K, K), jnp.float32) * (1.0 / (Cin * K * K) ** 0.5)
    w2_oihw = jax.random.normal(k2, (Cout, Cmid, K, K), jnp.float32) * (1.0 / (Cmid * K * K) ** 0.5)

    out = jax.block_until_ready(conv_block(x, w1_oihw, w2_oihw))
    ref = jax.block_until_ready(_ref_conv_block(x, w1_oihw, w2_oihw))

    assert out.shape == (B, Cout, H, W), out.shape
    err = float(jnp.max(jnp.abs(out - ref)))
    assert jnp.allclose(out, ref, atol=1e-3, rtol=1e-3), err
    print("KERNEL_OK")
</pallas_src>

<mosaic_0001>
module attributes {stable_mosaic.version = 11 : i64} {
  func.func @_conv_block_kernel(%arg0: i32, %arg1: memref<1x4x256xf32, #tpu.memory_space<vmem>>, %arg2: memref<8x36xf32, #tpu.memory_space<vmem>>, %arg3: memref<8x72xf32, #tpu.memory_space<vmem>>, %arg4: memref<1x8x256xf32, #tpu.memory_space<vmem>>, %arg5: memref<36x256xf32, #tpu.memory_space<vmem>>, %arg6: memref<72x256xf32, #tpu.memory_space<vmem>>) attributes {dimension_semantics = [#tpu.dimension_semantics<parallel>], iteration_bounds = array<i64: 2>, scalar_prefetch = 0 : i64, scratch_operands = 2 : i64, tpu.core_type = #tpu.core_type<tc>, window_params = [{transform_indices = @transform_0, window_bounds = array<i64: 1, 4, 256>}, {pipeline_mode = #tpu.pipeline_mode<synchronous>, transform_indices = @transform_1, window_bounds = array<i64: 8, 36>}, {pipeline_mode = #tpu.pipeline_mode<synchronous>, transform_indices = @transform_2, window_bounds = array<i64: 8, 72>}, {transform_indices = @transform_3, window_bounds = array<i64: 1, 8, 256>}]} {
    %0 = tpu.iota {dimensions = array<i32: 1>} : vector<1x256xi32>
    %c16_i32 = arith.constant 16 : i32
    %c0_i32 = arith.constant 0 : i32
    %1 = arith.cmpi eq, %c16_i32, %c0_i32 : i32
    %c1_i32 = arith.constant 1 : i32
    %2 = arith.select %1, %c1_i32, %c16_i32 : i32
    %3 = vector.broadcast %2 : i32 to vector<1x256xi32>
    %4 = arith.remsi %0, %3 : vector<1x256xi32>
    %c0_i32_0 = arith.constant 0 : i32
    %5 = vector.broadcast %c0_i32_0 : i32 to vector<1x256xi32>
    %6 = arith.cmpi ne, %4, %5 : vector<1x256xi32>
    %c0_i32_1 = arith.constant 0 : i32
    %7 = vector.broadcast %c0_i32_1 : i32 to vector<1x256xi32>
    %8 = arith.cmpi slt, %4, %7 : vector<1x256xi32>
    %c0_i32_2 = arith.constant 0 : i32
    %9 = arith.cmpi slt, %2, %c0_i32_2 : i32
    %10 = vector.broadcast %9 : i1 to vector<1x256xi1>
    %11 = vector.broadcast %10 : vector<1x256xi1> to vector<1x256xi1>
    %12 = arith.xori %8, %11 : vector<1x256xi1>
    %13 = arith.andi %12, %6 : vector<1x256xi1>
    %14 = vector.broadcast %2 : i32 to vector<1x256xi32>
    %15 = arith.addi %4, %14 : vector<1x256xi32>
    %16 = arith.select %13, %15, %4 : vector<1x256xi1>, vector<1x256xi32>
    %c-1_i32 = arith.constant -1 : i32
    %17 = vector.broadcast %c-1_i32 : i32 to vector<1x256xi32>
    %18 = arith.addi %16, %17 : vector<1x256xi32>
    %c0_i32_3 = arith.constant 0 : i32
    %19 = vector.broadcast %c0_i32_3 : i32 to vector<1x256xi32>
    %20 = arith.cmpi sge, %18, %19 : vector<1x256xi32>
    %c-1_i32_4 = arith.constant -1 : i32
    %21 = vector.broadcast %c-1_i32_4 : i32 to vector<1x256xi32>
    %22 = arith.addi %16, %21 : vector<1x256xi32>
    %c16_i32_5 = arith.constant 16 : i32
    %23 = vector.broadcast %c16_i32_5 : i32 to vector<1x256xi32>
    %24 = arith.cmpi slt, %22, %23 : vector<1x256xi32>
    %25 = arith.andi %20, %24 : vector<1x256xi1>
    %c1_i32_6 = arith.constant 1 : i32
    %26 = vector.broadcast %c1_i32_6 : i32 to vector<1x256xi32>
    %27 = arith.addi %16, %26 : vector<1x256xi32>
    %c0_i32_7 = arith.constant 0 : i32
    %28 = vector.broadcast %c0_i32_7 : i32 to vector<1x256xi32>
    %29 = arith.cmpi sge, %27, %28 : vector<1x256xi32>
    %c1_i32_8 = arith.constant 1 : i32
    %30 = vector.broadcast %c1_i32_8 : i32 to vector<1x256xi32>
    %31 = arith.addi %16, %30 : vector<1x256xi32>
    %c16_i32_9 = arith.constant 16 : i32
    %32 = vector.broadcast %c16_i32_9 : i32 to vector<1x256xi32>
    %33 = arith.cmpi slt, %31, %32 : vector<1x256xi32>
    %34 = arith.andi %29, %33 : vector<1x256xi1>
    %c0 = arith.constant 0 : index
    %c0_10 = arith.constant 0 : index
    %c0_11 = arith.constant 0 : index
    %35 = vector.load %arg1[%c0, %c0_10, %c0_11] : memref<1x4x256xf32, #tpu.memory_space<vmem>>, vector<1x4x256xf32>
    %36 = vector.shape_cast %35 : vector<1x4x256xf32> to vector<4x256xf32>
    %cst = arith.constant 0.000000e+00 : f32
    %37 = vector.broadcast %cst : f32 to vector<4x17xf32>
    %38 = vector.extract_strided_slice %36 {offsets = [0, 0], sizes = [4, 239], strides = [1, 1]} : vector<4x256xf32> to vector<4x239xf32>
    %39 = tpu.concatenate %37, %38 in 1 : vector<4x17xf32>, vector<4x239xf32> -> vector<4x256xf32>
    %cst_12 = arith.constant 0.000000e+00 : f32
    %40 = vector.shape_cast %25 : vector<1x256xi1> to vector<1x256xi1>
    %41 = vector.broadcast %40 : vector<1x256xi1> to vector<4x256xi1>
    %42 = vector.broadcast %cst_12 : f32 to vector<4x256xf32>
    %43 = arith.select %41, %39, %42 : vector<4x256xi1>, vector<4x256xf32>
    %c0_13 = arith.constant 0 : index
    %c0_14 = arith.constant 0 : index
    %44 = vector.load %arg5[%c0_13, %c0_14] : memref<36x256xf32, #tpu.memory_space<vmem>>, vector<4x256xf32>
    tpu.vector_store %arg5[%c0_13, %c0_14], %43 {strides = array<i32>} : memref<36x256xf32, #tpu.memory_space<vmem>>, vector<4x256xf32>,
    %cst_15 = arith.constant 0.000000e+00 : f32
    %45 = vector.broadcast %cst_15 : f32 to vector<4x16xf32>
    %46 = vector.extract_strided_slice %36 {offsets = [0, 0], sizes = [4, 240], strides = [1, 1]} : vector<4x256xf32> to vector<4x240xf32>
    %47 = tpu.concatenate %45, %46 in 1 : vector<4x16xf32>, vector<4x240xf32> -> vector<4x256xf32>
    %c4 = arith.constant 4 : index
    %c0_16 = arith.constant 0 : index
    %48 = vector.load %arg5[%c4, %c0_16] : memref<36x256xf32, #tpu.memory_space<vmem>>, vector<4x256xf32>
    tpu.vector_store %arg5[%c4, %c0_16], %47 {strides = array<i32>} : memref<36x256xf32, #tpu.memory_space<vmem>>, vector<4x256xf32>,
    %cst_17 = arith.constant 0.000000e+00 : f32
    %49 = vector.broadcast %cst_17 : f32 to vector<4x15xf32>
    %50 = vector.extract_strided_slice %36 {offsets = [0, 0], sizes = [4, 241], strides = [1, 1]} : vector<4x256xf32> to vector<4x241xf32>
    %51 = tpu.concatenate %49, %50 in 1 : vector<4x15xf32>, vector<4x241xf32> -> vector<4x256xf32>
    %cst_18 = arith.constant 0.000000e+00 : f32
    %52 = vector.shape_cast %34 : vector<1x256xi1> to vector<1x256xi1>
    %53 = vector.broadcast %52 : vector<1x256xi1> to vector<4x256xi1>
    %54 = vector.broadcast %cst_18 : f32 to vector<4x256xf32>
    %55 = arith.select %53, %51, %54 : vector<4x256xi1>, vector<4x256xf32>
    %c8 = arith.constant 8 : index
    %c0_19 = arith.constant 0 : index
    %56 = vector.load %arg5[%c8, %c0_19] : memref<36x256xf32, #tpu.memory_space<vmem>>, vector<4x256xf32>
    tpu.vector_store %arg5[%c8, %c0_19], %55 {strides = array<i32>} : memref<36x256xf32, #tpu.memory_space<vmem>>, vector<4x256xf32>,
    %cst_20 = arith.constant 0.000000e+00 : f32
    %57 = vector.broadcast %cst_20 : f32 to vector<4x1xf32>
    %58 = vector.extract_strided_slice %36 {offsets = [0, 0], sizes = [4, 255], strides = [1, 1]} : vector<4x256xf32> to vector<4x255xf32>
    %59 = tpu.concatenate %57, %58 in 1 : vector<4x1xf32>, vector<4x255xf32> -> vector<4x256xf32>
    %cst_21 = arith.constant 0.000000e+00 : f32
    %60 = vector.shape_cast %25 : vector<1x256xi1> to vector<1x256xi1>
    %61 = vector.broadcast %60 : vector<1x256xi1> to vector<4x256xi1>
    %62 = vector.broadcast %cst_21 : f32 to vector<4x256xf32>
    %63 = arith.select %61, %59, %62 : vector<4x256xi1>, vector<4x256xf32>
    %c12 = arith.constant 12 : index
    %c0_22 = arith.constant 0 : index
    %64 = vector.load %arg5[%c12, %c0_22] : memref<36x256xf32, #tpu.memory_space<vmem>>, vector<4x256xf32>
    tpu.vector_store %arg5[%c12, %c0_22], %63 {strides = array<i32>} : memref<36x256xf32, #tpu.memory_space<vmem>>, vector<4x256xf32>,
    %c16 = arith.constant 16 : index
    %c0_23 = arith.constant 0 : index
    %65 = vector.load %arg5[%c16, %c0_23] : memref<36x256xf32, #tpu.memory_space<vmem>>, vector<4x256xf32>
    tpu.vector_store %arg5[%c16, %c0_23], %36 {strides = array<i32>} : memref<36x256xf32, #tpu.memory_space<vmem>>, vector<4x256xf32>,
    %66 = vector.extract_strided_slice %36 {offsets = [0, 1], sizes = [4, 255], strides = [1, 1]} : vector<4x256xf32> to vector<4x255xf32>
    %cst_24 = arith.constant 0.000000e+00 : f32
    %67 = vector.broadcast %cst_24 : f32 to vector<4x1xf32>
    %68 = tpu.concatenate %66, %67 in 1 : vector<4x255xf32>, vector<4x1xf32> -> vector<4x256xf32>
    %cst_25 = arith.constant 0.000000e+00 : f32
    %69 = vector.shape_cast %34 : vector<1x256xi1> to vector<1x256xi1>
    %70 = vector.broadcast %69 : vector<1x256xi1> to vector<4x256xi1>
    %71 = vector.broadcast %cst_25 : f32 to vector<4x256xf32>
    %72 = arith.select %70, %68, %71 : vector<4x256xi1>, vector<4x256xf32>
    %c20 = arith.constant 20 : index
    %c0_26 = arith.constant 0 : index
    %73 = vector.load %arg5[%c20, %c0_26] : memref<36x256xf32, #tpu.memory_space<vmem>>, vector<4x256xf32>
    tpu.vector_store %arg5[%c20, %c0_26], %72 {strides = array<i32>} : memref<36x256xf32, #tpu.memory_space<vmem>>, vector<4x256xf32>,
    %74 = vector.extract_strided_slice %36 {offsets = [0, 15], sizes = [4, 241], strides = [1, 1]} : vector<4x256xf32> to vector<4x241xf32>
    %cst_27 = arith.constant 0.000000e+00 : f32
    %75 = vector.broadcast %cst_27 : f32 to vector<4x15xf32>
    %76 = tpu.concatenate %74, %75 in 1 : vector<4x241xf32>, vector<4x15xf32> -> vector<4x256xf32>
    %cst_28 = arith.constant 0.000000e+00 : f32
    %77 = vector.shape_cast %25 : vector<1x256xi1> to vector<1x256xi1>
    %78 = vector.broadcast %77 : vector<1x256xi1> to vector<4x256xi1>
    %79 = vector.broadcast %cst_28 : f32 to vector<4x256xf32>
    %80 = arith.select %78, %76, %79 : vector<4x256xi1>, vector<4x256xf32>
    %c24 = arith.constant 24 : index
    %c0_29 = arith.constant 0 : index
    %81 = vector.load %arg5[%c24, %c0_29] : memref<36x256xf32, #tpu.memory_space<vmem>>, vector<4x256xf32>
    tpu.vector_store %arg5[%c24, %c0_29], %80 {strides = array<i32>} : memref<36x256xf32, #tpu.memory_space<vmem>>, vector<4x256xf32>,
    %82 = vector.extract_strided_slice %36 {offsets = [0, 16], sizes = [4, 240], strides = [1, 1]} : vector<4x256xf32> to vector<4x240xf32>
    %cst_30 = arith.constant 0.000000e+00 : f32
    %83 = vector.broadcast %cst_30 : f32 to vector<4x16xf32>
    %84 = tpu.concatenate %82, %83 in 1 : vector<4x240xf32>, vector<4x16xf32> -> vector<4x256xf32>
    %c28 = arith.constant 28 : index
    %c0_31 = arith.constant 0 : index
    %85 = vector.load %arg5[%c28, %c0_31] : memref<36x256xf32, #tpu.memory_space<vmem>>, vector<4x256xf32>
    tpu.vector_store %arg5[%c28, %c0_31], %84 {strides = array<i32>} : memref<36x256xf32, #tpu.memory_space<vmem>>, vector<4x256xf32>,
    %86 = vector.extract_strided_slice %36 {offsets = [0, 17], sizes = [4, 239], strides = [1, 1]} : vector<4x256xf32> to vector<4x239xf32>
    %cst_32 = arith.constant 0.000000e+00 : f32
    %87 = vector.broadcast %cst_32 : f32 to vector<4x17xf32>
    %88 = tpu.concatenate %86, %87 in 1 : vector<4x239xf32>, vector<4x17xf32> -> vector<4x256xf32>
    %cst_33 = arith.constant 0.000000e+00 : f32
    %89 = vector.shape_cast %34 : vector<1x256xi1> to vector<1x256xi1>
    %90 = vector.broadcast %89 : vector<1x256xi1> to vector<4x256xi1>
    %91 = vector.broadcast %cst_33 : f32 to vector<4x256xf32>
    %92 = arith.select %90, %88, %91 : vector<4x256xi1>, vector<4x256xf32>
    %c32 = arith.constant 32 : index
    %c0_34 = arith.constant 0 : index
    %93 = vector.load %arg5[%c32, %c0_34] : memref<36x256xf32, #tpu.memory_space<vmem>>, vector<4x256xf32>
    tpu.vector_store %arg5[%c32, %c0_34], %92 {strides = array<i32>} : memref<36x256xf32, #tpu.memory_space<vmem>>, vector<4x256xf32>,
    %c0_35 = arith.constant 0 : index
    %c0_36 = arith.constant 0 : index
    %94 = vector.load %arg2[%c0_35, %c0_36] : memref<8x36xf32, #tpu.memory_space<vmem>>, vector<8x36xf32>
    %c0_37 = arith.constant 0 : index
    %c0_38 = arith.constant 0 : index
    %95 = vector.load %arg5[%c0_37, %c0_38] : memref<36x256xf32, #tpu.memory_space<vmem>>, vector<36x256xf32>
    %cst_39 = arith.constant dense<0.000000e+00> : vector<8x256xf32>
    %96 = tpu.matmul %94, %95, %cst_39 {dimension_numbers = #tpu.dot_dimension_numbers<[1], [0], [0], [1], [0, 0, 1, 1], [], []>} : vector<8x36xf32>, vector<36x256xf32>, vector<8x256xf32> -> vector<8x256xf32>
    %cst_40 = arith.constant dense<0.000000e+00> : vector<8xf32>
    %97 = vector.multi_reduction <add>, %96, %cst_40 [1] : vector<8x256xf32> to vector<8xf32>
    %98 = vector.shape_cast %97 : vector<8xf32> to vector<8x1xf32>
    %cst_41 = arith.constant 3.906250e-03 : f32
    %99 = vector.broadcast %cst_41 : f32 to vector<8x1xf32>
    %100 = arith.mulf %98, %99 : vector<8x1xf32>
    %101 = arith.mulf %96, %96 : vector<8x256xf32>
    %cst_42 = arith.constant dense<0.000000e+00> : vector<8xf32>
    %102 = vector.multi_reduction <add>, %101, %cst_42 [1] : vector<8x256xf32> to vector<8xf32>
    %103 = vector.shape_cast %102 : vector<8xf32> to vector<8x1xf32>
    %cst_43 = arith.constant 3.906250e-03 : f32
    %104 = vector.broadcast %cst_43 : f32 to vector<8x1xf32>
    %105 = arith.mulf %103, %104 : vector<8x1xf32>
    %106 = arith.mulf %100, %100 : vector<8x1xf32>
    %107 = arith.subf %105, %106 : vector<8x1xf32>
    %cst_44 = arith.constant 0.000000e+00 : f32
    %108 = vector.broadcast %cst_44 : f32 to vector<8x1xf32>
    %109 = arith.maximumf %107, %108 : vector<8x1xf32>
    %110 = vector.broadcast %100 : vector<8x1xf32> to vector<8x256xf32>
    %111 = arith.subf %96, %110 : vector<8x256xf32>
    %cst_45 = arith.constant 9.99999974E-6 : f32
    %112 = vector.broadcast %cst_45 : f32 to vector<8x1xf32>
    %113 = arith.addf %109, %112 : vector<8x1xf32>
    %114 = math.rsqrt %113 : vector<8x1xf32>
    %115 = vector.broadcast %114 : vector<8x1xf32> to vector<8x256xf32>
    %116 = arith.mulf %111, %115 : vector<8x256xf32>
    %cst_46 = arith.constant 0.000000e+00 : f32
    %117 = vector.broadcast %cst_46 : f32 to vector<8x256xf32>
    %118 = arith.cmpf oge, %116, %117 : vector<8x256xf32>
    %cst_47 = arith.constant 0.00999999977 : f32
    %119 = vector.broadcast %cst_47 : f32 to vector<8x256xf32>
    %120 = arith.mulf %119, %116 : vector<8x256xf32>
    %121 = arith.select %118, %116, %120 : vector<8x256xi1>, vector<8x256xf32>
    %cst_48 = arith.constant 0.000000e+00 : f32
    %122 = vector.broadcast %cst_48 : f32 to vector<8x17xf32>
    %123 = vector.extract_strided_slice %121 {offsets = [0, 0], sizes = [8, 239], strides = [1, 1]} : vector<8x256xf32> to vector<8x239xf32>
    %124 = tpu.concatenate %122, %123 in 1 : vector<8x17xf32>, vector<8x239xf32> -> vector<8x256xf32>
    %cst_49 = arith.constant 0.000000e+00 : f32
    %125 = vector.shape_cast %25 : vector<1x256xi1> to vector<1x256xi1>
    %126 = vector.broadcast %125 : vector<1x256xi1> to vector<8x256xi1>
    %127 = vector.broadcast %cst_49 : f32 to vector<8x256xf32>
    %128 = arith.select %126, %124, %127 : vector<8x256xi1>, vector<8x256xf32>
    %c0_50 = arith.constant 0 : index
    %c0_51 = arith.constant 0 : index
    %129 = vector.load %arg6[%c0_50, %c0_51] : memref<72x256xf32, #tpu.memory_space<vmem>>, vector<8x256xf32>
    tpu.vector_store %arg6[%c0_50, %c0_51], %128 {strides = array<i32>} : memref<72x256xf32, #tpu.memory_space<vmem>>, vector<8x256xf32>,
    %cst_52 = arith.constant 0.000000e+00 : f32
    %130 = vector.broadcast %cst_52 : f32 to vector<8x16xf32>
    %131 = vector.extract_strided_slice %121 {offsets = [0, 0], sizes = [8, 240], strides = [1, 1]} : vector<8x256xf32> to vector<8x240xf32>
    %132 = tpu.concatenate %130, %131 in 1 : vector<8x16xf32>, vector<8x240xf32> -> vector<8x256xf32>
    %c8_53 = arith.constant 8 : index
    %c0_54 = arith.constant 0 : index
    %133 = vector.load %arg6[%c8_53, %c0_54] : memref<72x256xf32, #tpu.memory_space<vmem>>, vector<8x256xf32>
    tpu.vector_store %arg6[%c8_53, %c0_54], %132 {strides = array<i32>} : memref<72x256xf32, #tpu.memory_space<vmem>>, vector<8x256xf32>,
    %cst_55 = arith.constant 0.000000e+00 : f32
    %134 = vector.broadcast %cst_55 : f32 to vector<8x15xf32>
    %135 = vector.extract_strided_slice %121 {offsets = [0, 0], sizes = [8, 241], strides = [1, 1]} : vector<8x256xf32> to vector<8x241xf32>
    %136 = tpu.concatenate %134, %135 in 1 : vector<8x15xf32>, vector<8x241xf32> -> vector<8x256xf32>
    %cst_56 = arith.constant 0.000000e+00 : f32
    %137 = vector.shape_cast %34 : vector<1x256xi1> to vector<1x256xi1>
    %138 = vector.broadcast %137 : vector<1x256xi1> to vector<8x256xi1>
    %139 = vector.broadcast %cst_56 : f32 to vector<8x256xf32>
    %140 = arith.select %138, %136, %139 : vector<8x256xi1>, vector<8x256xf32>
    %c16_57 = arith.constant 16 : index
    %c0_58 = arith.constant 0 : index
    %141 = vector.load %arg6[%c16_57, %c0_58] : memref<72x256xf32, #tpu.memory_space<vmem>>, vector<8x256xf32>
    tpu.vector_store %arg6[%c16_57, %c0_58], %140 {strides = array<i32>} : memref<72x256xf32, #tpu.memory_space<vmem>>, vector<8x256xf32>,
    %cst_59 = arith.constant 0.000000e+00 : f32
    %142 = vector.broadcast %cst_59 : f32 to vector<8x1xf32>
    %143 = vector.extract_strided_slice %121 {offsets = [0, 0], sizes = [8, 255], strides = [1, 1]} : vector<8x256xf32> to vector<8x255xf32>
    %144 = tpu.concatenate %142, %143 in 1 : vector<8x1xf32>, vector<8x255xf32> -> vector<8x256xf32>
    %cst_60 = arith.constant 0.000000e+00 : f32
    %145 = vector.shape_cast %25 : vector<1x256xi1> to vector<1x256xi1>
    %146 = vector.broadcast %145 : vector<1x256xi1> to vector<8x256xi1>
    %147 = vector.broadcast %cst_60 : f32 to vector<8x256xf32>
    %148 = arith.select %146, %144, %147 : vector<8x256xi1>, vector<8x256xf32>
    %c24_61 = arith.constant 24 : index
    %c0_62 = arith.constant 0 : index
    %149 = vector.load %arg6[%c24_61, %c0_62] : memref<72x256xf32, #tpu.memory_space<vmem>>, vector<8x256xf32>
    tpu.vector_store %arg6[%c24_61, %c0_62], %148 {strides = array<i32>} : memref<72x256xf32, #tpu.memory_space<vmem>>, vector<8x256xf32>,
    %c32_63 = arith.constant 32 : index
    %c0_64 = arith.constant 0 : index
    %150 = vector.load %arg6[%c32_63, %c0_64] : memref<72x256xf32, #tpu.memory_space<vmem>>, vector<8x256xf32>
    tpu.vector_store %arg6[%c32_63, %c0_64], %121 {strides = array<i32>} : memref<72x256xf32, #tpu.memory_space<vmem>>, vector<8x256xf32>,
    %151 = vector.extract_strided_slice %121 {offsets = [0, 1], sizes = [8, 255], strides = [1, 1]} : vector<8x256xf32> to vector<8x255xf32>
    %cst_65 = arith.constant 0.000000e+00 : f32
    %152 = vector.broadcast %cst_65 : f32 to vector<8x1xf32>
    %153 = tpu.concatenate %151, %152 in 1 : vector<8x255xf32>, vector<8x1xf32> -> vector<8x256xf32>
    %cst_66 = arith.constant 0.000000e+00 : f32
    %154 = vector.shape_cast %34 : vector<1x256xi1> to vector<1x256xi1>
    %155 = vector.broadcast %154 : vector<1x256xi1> to vector<8x256xi1>
    %156 = vector.broadcast %cst_66 : f32 to vector<8x256xf32>
    %157 = arith.select %155, %153, %156 : vector<8x256xi1>, vector<8x256xf32>
    %c40 = arith.constant 40 : index
    %c0_67 = arith.constant 0 : index
    %158 = vector.load %arg6[%c40, %c0_67] : memref<72x256xf32, #tpu.memory_space<vmem>>, vector<8x256xf32>
    tpu.vector_store %arg6[%c40, %c0_67], %157 {strides = array<i32>} : memref<72x256xf32, #tpu.memory_space<vmem>>, vector<8x256xf32>,
    %159 = vector.extract_strided_slice %121 {offsets = [0, 15], sizes = [8, 241], strides = [1, 1]} : vector<8x256xf32> to vector<8x241xf32>
    %cst_68 = arith.constant 0.000000e+00 : f32
    %160 = vector.broadcast %cst_68 : f32 to vector<8x15xf32>
    %161 = tpu.concatenate %159, %160 in 1 : vector<8x241xf32>, vector<8x15xf32> -> vector<8x256xf32>
    %cst_69 = arith.constant 0.000000e+00 : f32
    %162 = vector.shape_cast %25 : vector<1x256xi1> to vector<1x256xi1>
    %163 = vector.broadcast %162 : vector<1x256xi1> to vector<8x256xi1>
    %164 = vector.broadcast %cst_69 : f32 to vector<8x256xf32>
    %165 = arith.select %163, %161, %164 : vector<8x256xi1>, vector<8x256xf32>
    %c48 = arith.constant 48 : index
    %c0_70 = arith.constant 0 : index
    %166 = vector.load %arg6[%c48, %c0_70] : memref<72x256xf32, #tpu.memory_space<vmem>>, vector<8x256xf32>
    tpu.vector_store %arg6[%c48, %c0_70], %165 {strides = array<i32>} : memref<72x256xf32, #tpu.memory_space<vmem>>, vector<8x256xf32>,
    %167 = vector.extract_strided_slice %121 {offsets = [0, 16], sizes = [8, 240], strides = [1, 1]} : vector<8x256xf32> to vector<8x240xf32>
    %cst_71 = arith.constant 0.000000e+00 : f32
    %168 = vector.broadcast %cst_71 : f32 to vector<8x16xf32>
    %169 = tpu.concatenate %167, %168 in 1 : vector<8x240xf32>, vector<8x16xf32> -> vector<8x256xf32>
    %c56 = arith.constant 56 : index
    %c0_72 = arith.constant 0 : index
    %170 = vector.load %arg6[%c56, %c0_72] : memref<72x256xf32, #tpu.memory_space<vmem>>, vector<8x256xf32>
    tpu.vector_store %arg6[%c56, %c0_72], %169 {strides = array<i32>} : memref<72x256xf32, #tpu.memory_space<vmem>>, vector<8x256xf32>,
    %171 = vector.extract_strided_slice %121 {offsets = [0, 17], sizes = [8, 239], strides = [1, 1]} : vector<8x256xf32> to vector<8x239xf32>
    %cst_73 = arith.constant 0.000000e+00 : f32
    %172 = vector.broadcast %cst_73 : f32 to vector<8x17xf32>
    %173 = tpu.concatenate %171, %172 in 1 : vector<8x239xf32>, vector<8x17xf32> -> vector<8x256xf32>
    %cst_74 = arith.constant 0.000000e+00 : f32
    %174 = vector.shape_cast %34 : vector<1x256xi1> to vector<1x256xi1>
    %175 = vector.broadcast %174 : vector<1x256xi1> to vector<8x256xi1>
    %176 = vector.broadcast %cst_74 : f32 to vector<8x256xf32>
    %177 = arith.select %175, %173, %176 : vector<8x256xi1>, vector<8x256xf32>
    %c64 = arith.constant 64 : index
    %c0_75 = arith.constant 0 : index
    %178 = vector.load %arg6[%c64, %c0_75] : memref<72x256xf32, #tpu.memory_space<vmem>>, vector<8x256xf32>
    tpu.vector_store %arg6[%c64, %c0_75], %177 {strides = array<i32>} : memref<72x256xf32, #tpu.memory_space<vmem>>, vector<8x256xf32>,
    %c0_76 = arith.constant 0 : index
    %c0_77 = arith.constant 0 : index
    %179 = vector.load %arg3[%c0_76, %c0_77] : memref<8x72xf32, #tpu.memory_space<vmem>>, vector<8x72xf32>
    %c0_78 = arith.constant 0 : index
    %c0_79 = arith.constant 0 : index
    %180 = vector.load %arg6[%c0_78, %c0_79] : memref<72x256xf32, #tpu.memory_space<vmem>>, vector<72x256xf32>
    %cst_80 = arith.constant dense<0.000000e+00> : vector<8x256xf32>
    %181 = tpu.matmul %179, %180, %cst_80 {dimension_numbers = #tpu.dot_dimension_numbers<[1], [0], [0], [1], [0, 0, 1, 1], [], []>} : vector<8x72xf32>, vector<72x256xf32>, vector<8x256xf32> -> vector<8x256xf32>
    %cst_81 = arith.constant dense<0.000000e+00> : vector<8xf32>
    %182 = vector.multi_reduction <add>, %181, %cst_81 [1] : vector<8x256xf32> to vector<8xf32>
    %183 = vector.shape_cast %182 : vector<8xf32> to vector<8x1xf32>
    %cst_82 = arith.constant 3.906250e-03 : f32
    %184 = vector.broadcast %cst_82 : f32 to vector<8x1xf32>
    %185 = arith.mulf %183, %184 : vector<8x1xf32>
    %186 = arith.mulf %181, %181 : vector<8x256xf32>
    %cst_83 = arith.constant dense<0.000000e+00> : vector<8xf32>
    %187 = vector.multi_reduction <add>, %186, %cst_83 [1] : vector<8x256xf32> to vector<8xf32>
    %188 = vector.shape_cast %187 : vector<8xf32> to vector<8x1xf32>
    %cst_84 = arith.constant 3.906250e-03 : f32
    %189 = vector.broadcast %cst_84 : f32 to vector<8x1xf32>
    %190 = arith.mulf %188, %189 : vector<8x1xf32>
    %191 = arith.mulf %185, %185 : vector<8x1xf32>
    %192 = arith.subf %190, %191 : vector<8x1xf32>
    %cst_85 = arith.constant 0.000000e+00 : f32
    %193 = vector.broadcast %cst_85 : f32 to vector<8x1xf32>
    %194 = arith.maximumf %192, %193 : vector<8x1xf32>
    %195 = vector.broadcast %185 : vector<8x1xf32> to vector<8x256xf32>
    %196 = arith.subf %181, %195 : vector<8x256xf32>
    %cst_86 = arith.constant 9.99999974E-6 : f32
    %197 = vector.broadcast %cst_86 : f32 to vector<8x1xf32>
    %198 = arith.addf %194, %197 : vector<8x1xf32>
    %199 = math.rsqrt %198 : vector<8x1xf32>
    %200 = vector.broadcast %199 : vector<8x1xf32> to vector<8x256xf32>
    %201 = arith.mulf %196, %200 : vector<8x256xf32>
    %cst_87 = arith.constant 0.000000e+00 : f32
    %202 = vector.broadcast %cst_87 : f32 to vector<8x256xf32>
    %203 = arith.cmpf oge, %201, %202 : vector<8x256xf32>
    %cst_88 = arith.constant 0.00999999977 : f32
    %204 = vector.broadcast %cst_88 : f32 to vector<8x256xf32>
    %205 = arith.mulf %204, %201 : vector<8x256xf32>
    %206 = arith.select %203, %201, %205 : vector<8x256xi1>, vector<8x256xf32>
    %c0_89 = arith.constant 0 : index
    %c0_90 = arith.constant 0 : index
    %c0_91 = arith.constant 0 : index
    %207 = vector.load %arg4[%c0_89, %c0_90, %c0_91] : memref<1x8x256xf32, #tpu.memory_space<vmem>>, vector<1x8x256xf32>
    %208 = vector.shape_cast %207 : vector<1x8x256xf32> to vector<8x256xf32>
    %209 = vector.shape_cast %206 : vector<8x256xf32> to vector<1x8x256xf32>
    tpu.vector_store %arg4[%c0_89, %c0_90, %c0_91], %209 {strides = array<i32>} : memref<1x8x256xf32, #tpu.memory_space<vmem>>, vector<1x8x256xf32>,
    return
  }
  func.func @transform_0(%arg0: i32) -> (i32, i32, i32) {
    %c0_i32 = arith.constant 0 : i32
    %c0_i32_0 = arith.constant 0 : i32
    %c0_i32_1 = arith.constant 0 : i32
    return %arg0, %c0_i32, %c0_i32_0 : i32, i32, i32
  }
  func.func @transform_1(%arg0: i32) -> (i32, i32) {
    %c0_i32 = arith.constant 0 : i32
    %c0_i32_0 = arith.constant 0 : i32
    %c0_i32_1 = arith.constant 0 : i32
    return %c0_i32, %c0_i32_0 : i32, i32
  }
  func.func @transform_2(%arg0: i32) -> (i32, i32) {
    %c0_i32 = arith.constant 0 : i32
    %c0_i32_0 = arith.constant 0 : i32
    %c0_i32_1 = arith.constant 0 : i32
    return %c0_i32, %c0_i32_0 : i32, i32
  }
  func.func @transform_3(%arg0: i32) -> (i32, i32, i32) {
    %c0_i32 = arith.constant 0 : i32
    %c0_i32_0 = arith.constant 0 : i32
    %c0_i32_1 = arith.constant 0 : i32
    return %arg0, %c0_i32, %c0_i32_0 : i32, i32, i32
  }
}

</mosaic_0001>

<bundles_post_ra>
// kernel: tpu_custom_call.1
= control target key start
LH: loop header
LB: loop body
LE: loop exit
PB: predicated region body
PF: predicated region fallthrough
CT: control target
= control target key end

     0   :  { %8 = vsyncpa [#allocation5], 0  ;;  %s1561_s0 = inlined_call_operand.hbm [shape: f32[2,4,256], index: 0, kind: input, shape index: {}]   ;;  %s1562_s1 = inlined_call_operand.hbm [shape: f32[8,36], index: 1, kind: input, shape index: {}]   ;;  %s1563_s2 = inlined_call_operand.hbm [shape: f32[8,72], index: 2, kind: input, shape index: {}]   ;;  %s1564_s3 = inlined_call_operand.hbm [shape: f32[2,8,256], index: 3, kind: output, shape index: {}]  }
   0x1   :  { %10 = vsyncpa [#allocation5 + $0x1], 0 }
   0x2   :  { %11 = vsyncpa [#allocation8], 0 }
   0x3   :  { %12 = vsyncpa [#allocation6], 0 }
   0x4   :  { %14 = vsyncpa [#allocation6 + $0x1], 0  ;;  %s1208_s12 = smov 0   ;;  %s1210_s13 = smov 0  }
   0x5   :  { %s1212_s14 = smov 0   ;;  %s1214_s15 = smov 0  }
   0x6 LB: > { %s1229_s16 = sadd.s32 4294967295, %s1172_s15   ;;  %s828_s17 = sadd.s32 4294967294, %s1172_s15   ;;  %s1172_s15 = sphi %s1214_s15, %s1584_s15   ;;  %s1168_s14 = sphi %s1212_s14, %s1583_s14   ;;  %s1164_s13 = sphi %s1210_s13, %s1582_s13   ;;  %s1160_s12 = sphi %s1208_s12, %s1581_s12  }
   0x7   : > { %p40_p0 = scmp.ne.s32.totalorder %s1164_s13, %s1160_s12  ;;  %p1565_p1 = scmp.eq.s32.totalorder %s1229_s16, 0 }
   0x8   : > { %p112_p3 = scmp.eq.s32.totalorder %s828_s17, 1  ;;  %p829_p5 = scmp.ge.s32.totalorder %s1172_s15, 1 }
   0x9   : > { %p1238_p4 = por %p1565_p1, %p40_p0  ;;  %p119_p7 = scmp.lt.s32.totalorder %s1172_s15, 3 }
   0xa   : > { %p1243_p6 = por %p112_p3, %p40_p0  ;;  %s1174_s21 = smov [#allocation7]  }
   0xb   : > { %s1568_s18 = scalar_select %p1238_p4, 1, 0 }
   0xc   : > { %s1569_s19 = scalar_select %p1243_p6, 1, 0 }
   0xd   : > { %p1248_p8 = pnand %p829_p5, %p119_p7  ;;  %s132_s22 = sshll.u32 %s1174_s21, 4  ;;  %s133_s22 = int_to_ptr.vmem [resolvable:$true] %s132_s22 }
   0xe   : > { %s1175_s23 = smov [#allocation9]   ;;  %s1264_s26 = sadd.s32 1, %s1172_s15  }
   0xf   : > { %s1570_s20 = scalar_select %p1248_p8, 1, 0 }
  0x10   : > { %p911_p10 = pneg %p1248_p8  ;;  %s143_s24 = sshll.u32 %s1175_s23, 4  ;;  %s1261_s24 = int_to_ptr.vmem [resolvable:$true] %s143_s24 }
  0x11   : > { %s24_s27 = ssub.s32 %s1172_s15, %s1264_s26  ;;  %s1016_s30 = scalar_lea.hbm %s1562_s1, 128 }
  0x12   : > { %p1257_p11 = pnand %p911_p10, %p1565_p1  ;;  %p1017_p12 = scmp.ne.s32.totalorder %s1562_s1, %s1016_s30 }
  0x13   : > { %p1023_p5 = scmp.lt.u32.totalorder %s1016_s30, %s1562_s1 }
  0x14   : > { %p1018_p13 = pneg %p1257_p11 }
  0x16   : > { %p1019_p0 = pnand %p1018_p13, %p1017_p12 }
  0x18   : > { %p1020_p3 = pneg %p1019_p0 }
  0x1a   : > { %p1025_p7 = pnand %p1023_p5, %p1020_p3 }
  0x1c   : > { %1028 = shalt.err (!%p1025_p7)
}
  0x1d   : > { %s1029_s8 = scalar_lea.vmem %s133_s22, 128  ;;  %p1037_p2 = scmp.lt.s32.totalorder %s133_s22, %s133_s22 }
  0x1e   : > { %p1030_p10 = scmp.ne.s32.totalorder %s133_s22, %s1029_s8  ;;  %p1038_p6 = scmp.lt.s32.totalorder %s1029_s8, %s1029_s8 }
  0x20   : > { %p1032_p9 = pnand %p1030_p10, %p1018_p13  ;;  %p1039_p4 = por %p1038_p6, %p1037_p2 }
  0x22   : > { %p1033_p1 = pneg %p1032_p9 }
  0x24   : > { %p1040_p8 = pnand %p1039_p4, %p1033_p1 }
  0x26   : > { %1043 = shalt.err (!%p1040_p8)
}
  0x27   : > { %914 = dma.hbm_to_vmem [thread:$0]  (!%p1257_p11), %s1562_s1, 128, %s133_s22, [#allocation8]  }
  0x28   : > { %s1044_s21 = scalar_lea.hbm %s1563_s2, 128 }
  0x29   : > { %p1045_p9 = scmp.ne.s32.totalorder %s1563_s2, %s1044_s21  ;;  %p1051_p4 = scmp.lt.u32.totalorder %s1044_s21, %s1563_s2 }
  0x2b   : > { %p1047_p2 = pnand %p1045_p9, %p1018_p13 }
  0x2d   : > { %p1048_p1 = pneg %p1047_p2 }
  0x2f   : > { %p1053_p6 = pnand %p1051_p4, %p1048_p1 }
  0x31   : > { %1056 = shalt.err (!%p1053_p6)
}
  0x32   : > { %s1057_s22 = scalar_lea.vmem %s1261_s24, 128  ;;  %p1065_p3 = scmp.lt.s32.totalorder %s1261_s24, %s1261_s24 }
  0x33   : > { %p1058_p8 = scmp.ne.s32.totalorder %s1261_s24, %s1057_s22  ;;  %p1066_p5 = scmp.lt.s32.totalorder %s1057_s22, %s1057_s22 }
  0x35   : > { %p1060_p12 = pnand %p1058_p8, %p1018_p13  ;;  %p1067_p7 = por %p1066_p5, %p1065_p3 }
  0x37   : > { %p1061_p0 = pneg %p1060_p12 }
  0x39   : > { %p1068_p10 = pnand %p1067_p7, %p1061_p0 }
  0x3b   : > { %1071 = shalt.err (!%p1068_p10)
}
  0x3c   : > { %917 = dma.hbm_to_vmem [thread:$0]  (!%p1257_p11), %s1563_s2, 128, %s1261_s24, [#allocation8]  }
  0x3d   : > { %p25_p13 = scmp.eq.s32.totalorder %s24_s27, 0  ;;  %s27_s6 = sadd.s32 1, %s1168_s14 }
  0x3e   : > { %p34_p9 = scmp.ne.s32.totalorder %s1168_s14, %s1164_s13  ;;  %p35_p2 = scmp.eq.s32.totalorder %s1172_s15, 0 }
  0x3f   : > { %s1323_s25 = scalar_select %p25_p13, %s1168_s14, %s27_s6  }
  0x40   : > { %p36_p1 = por %p35_p2, %p34_p9  ;;  %p1572_p4 = scmp.eq.s32.totalorder %s1229_s16, 1 }
  0x41   : > { %p928_p8 = scmp.lt.s32.totalorder %s1172_s15, 2  ;;  %s154_s8 = sand.u32 1, %s1168_s14  }
  0x42   : > { %p1327_p6 = por %p1572_p4, %p34_p9  ;;  %s833_s9 = sshll.u32 %s154_s8, 3 }
  0x43   : > { %s850_s10 = sshll.u32 %s1172_s15, 7  ;;  %s158_s27 = scalar_lea.vmem [#allocation4], %s833_s9 }
  0x44   : > { %s1337_s24 = scalar_lea.hbm %s1561_s0, %s850_s10  ;;  %s166_s21 = sshll.u32 %s158_s27, 4  ;;  %s1339_s21 = int_to_ptr.vmem [resolvable:$true] %s166_s21 }
  0x45   : > { %p1341_p11 = pnand %p928_p8, %p36_p1  ;;  %s155_s28 = scalar_lea.sflag [#allocation5], %s154_s8 }
  0x46   : > { %s1072_s29 = scalar_lea.hbm %s1337_s24, 128  ;;  %s1077_s4 = scalar_lea.hbm %s1561_s0, 256 }
  0x47   : > { %p1073_p12 = scmp.ne.s32.totalorder %s1337_s24, %s1072_s29  ;;  %p1074_p0 = pneg %p1341_p11 }
  0x48   : > { %p1078_p7 = scmp.lt.u32.totalorder %s1337_s24, %s1561_s0  ;;  %p1079_p10 = scmp.lt.u32.totalorder %s1077_s4, %s1072_s29 }
  0x49   : > { %p1075_p3 = pnand %p1074_p0, %p1073_p12  ;;  %p1081_p9 = scmp.lt.u32.totalorder %s1072_s29, %s1337_s24 }
  0x4a   : > { %p1080_p13 = por %p1079_p10, %p1078_p7 }
  0x4b   : > { %p1076_p5 = pneg %p1075_p3 }
  0x4c   : > { %p1082_p2 = por %p1081_p9, %p1080_p13 }
  0x4e   : > { %p1083_p1 = pnand %p1082_p2, %p1076_p5 }
  0x50   : > { %1086 = shalt.err (!%p1083_p1)
}
  0x51   : > { %s1087_s8 = scalar_lea.vmem %s1339_s21, 128  ;;  %s1176_s9 = smov [#allocation4]  }
  0x52   : > { %p1088_p4 = scmp.ne.s32.totalorder %s1339_s21, %s1087_s8  ;;  %s1092_s10 = sshll.u32 %s1176_s9, 4  ;;  %s1093_s10 = int_to_ptr.vmem [resolvable:$false] %s1092_s10 }
  0x53   : > { %s1094_s11 = scalar_lea.vmem %s1093_s10, 256  ;;  %p1095_p3 = scmp.lt.s32.totalorder %s1339_s21, %s1093_s10 }
  0x54   : > { %p1090_p8 = pnand %p1088_p4, %p1074_p0  ;;  %p1096_p7 = scmp.lt.s32.totalorder %s1094_s11, %s1087_s8 }
  0x56   : > { %p1091_p12 = pneg %p1090_p8  ;;  %p1097_p10 = por %p1096_p7, %p1095_p3 }
  0x58   : > { %p1098_p13 = pnand %p1097_p10, %p1091_p12 }
  0x5a   : > { %1101 = shalt.err (!%p1098_p13)
}
  0x5b   : > { %921 = dma.hbm_to_vmem [thread:$0]  (!%p1341_p11), %s1337_s24, 128, %s1339_s21, %s155_s28  }
  0x5c   : > { %p1575_p5 = scmp.ne.s32.totalorder %s1570_s20, 0 }
  0x5d   : > { %s1373_s17 = sand.u32 (!%p1575_p5), 1, %s1164_s13   ;;  %p1576_p0 = scmp.ne.s32.totalorder (!%p1575_p5), %s1568_s18, 0 }
  0x5e   : > { %175 = sbr.rel (%p1575_p5) target bundleno = 1183 (0x49f), region = 32  ;;  %s837_s27 = sshll.u32 (!%p1575_p5), %s1373_s17, 3 }
  0x5f   : > { %s178_s29 = scalar_lea.sflag (!%p1575_p5), [#allocation5], %s1373_s17  ;;  %s181_s30 = scalar_lea.vmem (!%p1575_p5), [#allocation4], %s837_s27 }
  0x65   : > { %1147 = dma.done.wait (%p1576_p0), %s178_s29, 128  }
  0x66   : > { %1149 = vsyncadd (%p1576_p0), %s178_s29, 4294967168  ;;  %p1577_p9 = scmp.eq.s32.totalorder %s1229_s16, 0 }
  0x68   : > { %1151 = dma.done.wait (%p1577_p9), [#allocation8], 256   ;;  %p1578_p11 = pmov %p1577_p9 }
  0x69   : > { %v255_v0 = vld [vmem:[%s181_s30] sm:$0xff]  ;;  %s1177_s20 = smov 16   ;;  %s1178_s24 = smov 1   ;;  %v1185_v2 = vmov 0.0   ;;  %v212_v3 = vlaneseq  ;;  %vm279_vm0 = vcmask 130048   ;;  %vm311_vm1 = vcmask 7168  }
  0x6a   : > { %1153 = vsyncadd (%p1578_p11), [#allocation8], 4294967040  ;;  %275 = vrot.lane.b32.xlu1 %v255_v0, %s1177_s20  ;;  %327 = vst [vmem:[#allocation2 + $0x20] sm:$0xf] %v255_v0  ;;  %307 = vrot.lane.b32.xlu0 %v255_v0, %s1178_s24  ;;  %v257_v1 = vcombine.high %v255_v0, %v255_v0  ;;  %s1179_s21 = smov 17   ;;  %s1180_s18 = smov 15  }
  0x6b   : > { %s1181_s23 = smov 127   ;;  %s1182_s28 = smov 113   ;;  %475 = vmatprep.mubr.f32.mxu0 %v1185_v2  ;;  %690 = vmatprep.mubr.f32.mxu1 %v1185_v2  ;;  %v213_v4 = vand.u32 127, %v212_v3  ;;  %vm262_vm3 = vcmask 138240   ;;  %vm294_vm5 = vcmask 121856   ;;  %vm333_vm8 = vcmask 1039360  }
  0x6c   : > { %328 = vst [vmem:[#allocation2 + $0x28] sm:$0xf] %v257_v1  ;;  %s1183_s22 = smov 112   ;;  %s1184_s4 = smov 111   ;;  %vm352_vm9 = vcmask 924672   ;;  %vm365_vm10 = vcmask 916480  }
  0x6d   : > { %v219_v5 = vand.u32 15, %v213_v4  ;;  %v214_v7 = vadd.s32 128, %v213_v4  ;;  %vm380_vm11 = vcmask 908288   ;;  %vm404_vm12 = vcmask 1043456   ;;  %s840_s5 = sshll.u32 %s1373_s17, 4  ;;  %s851_s6 = sshll.u32 %s1229_s16, 8 }
  0x6e   : > { %258 = vrot.lane.b32.xlu0 %v255_v0, %s1179_s21  ;;  %277 = vrot.lane.b32.xlu1 %v257_v1, %s1177_s20  ;;  %vm400_vm13 = vcmask 293888   ;;  %s211_s8 = scalar_lea.vmem [#allocation10], %s840_s5  ;;  %s1517_s27 = scalar_lea.hbm %s1564_s3, %s851_s6 }
  0x6f   : > { %v1401_v6 = vadd.s32 4294967295, %v219_v5  ;;  %v226_v8 = vand.u32 15, %v214_v7  ;;  %v1415_v23 = vadd.s32 1, %v219_v5  ;;  %s739_s9 = sshll.u32 %s211_s8, 4  ;;  %s725_s16 = scalar_lea.sflag [#allocation6], %s1373_s17  ;;  %s1519_s9 = int_to_ptr.vmem [resolvable:$true] %s739_s9 }
  0x70   : > { %s1102_s29 = scalar_lea.vmem %s1519_s9, 256  ;;  %s1187_s30 = smov [#allocation10]  }
  0x71   : > { %vm241_vm2 = vcmp.ge.s32.totalorder %v1401_v6, 0  ;;  %v1408_v16 = vadd.s32 4294967295, %v226_v8  ;;  %v1417_v24 = vadd.s32 1, %v226_v8  ;;  %vm251_vm6 = vcmp.lt.s32.totalorder %v1415_v23, 16  ;;  %p1103_p2 = scmp.ne.s32.totalorder %s1519_s9, %s1102_s29 }
  0x72   : > { %260 = vrot.lane.b32.xlu1 %v257_v1, %s1179_s21  ;;  %309 = vrot.lane.b32.xlu0 %v257_v1, %s1178_s24 }
  0x73   : > { %vm242_vm4 = vcmp.ge.s32.totalorder %v1408_v16, 0  ;;  %vm252_vm7 = vcmp.lt.s32.totalorder %v1417_v24, 16  ;;  %v603_v16 = vld [vmem:[#allocation9] sm:$0xff]  ;;  %p1104_p1 = pnand %p1103_p2, %p1327_p6 }
  0x75   : > { %p1105_p4 = pneg %p1104_p1 }
  0x76   : > { %292 = vrot.lane.b32.xlu1 %v257_v1, %s1180_s18  ;;  %290 = vrot.lane.b32.xlu0 %v255_v0, %s1180_s18 }
  0x7a   : > { %329 = vrot.lane.b32.xlu1 %v255_v0, %s1181_s23  ;;  %331 = vrot.lane.b32.xlu0 %v257_v1, %s1181_s23 }
  0x7e   : > { %350 = vrot.lane.b32.xlu1 %v257_v1, %s1182_s28  ;;  %363 = vrot.lane.b32.xlu0 %v257_v1, %s1183_s22 }
  0x82   : > { %348 = vrot.lane.b32.xlu1 %v255_v0, %s1182_s28  ;;  %361 = vrot.lane.b32.xlu0 %v255_v0, %s1183_s22 }
  0x86   : > { %376 = vrot.lane.b32.xlu1 %v255_v0, %s1184_s4  ;;  %378 = vrot.lane.b32.xlu0 %v257_v1, %s1184_s4 }
  0xdc   : > { %v276_v9 = vpop.permute.xlu1 %275  ;;  %v308_v10 = vpop.permute.xlu0 %307 }
  0xdd   : > { %v282_v11 = vsel %vm279_vm0, 0.0, %v276_v9  ;;  %v315_v12 = vsel %vm311_vm1, 0.0, %v308_v10 }
  0xde   : > { %v284_v13 = vrot.slane %v282_v11, 4  ;;  %v316_v14 = vsel %vm241_vm2, %v315_v12, 0.0 }
  0xdf   : > { %v320_v15 = vrot.slane %v316_v14, 4 }
  0xe0   : > { %288 = vst [vmem:[#allocation2] sm:$0xf0] %v284_v13  ;;  %v259_v17 = vpop.permute.xlu0 %258  ;;  %v278_v18 = vpop.permute.xlu1 %277 }
  0xe1   : > { %324 = vst [vmem:[#allocation2 + $0x10] sm:$0xf0] %v320_v15  ;;  %v266_v19 = vsel %vm262_vm3, 0.0, %v259_v17  ;;  %v280_v20 = vsel %vm279_vm0, %v276_v9, %v278_v18  ;;  %v389_v15 = vld [vmem:[#allocation7] sm:$0xff] }
  0xe2   : > { %v271_v21 = vsel %vm241_vm2, %v266_v19, 0.0  ;;  %v285_v22 = vrot.slane %v280_v20, 4 }
  0xe3   : > { %273 = vst [vmem:[#allocation2] sm:$0xf] %v271_v21 }
  0xe4   : > { %289 = vst [vmem:[#allocation2 + $0x8] sm:$0xf0] %v285_v22  ;;  %v261_v25 = vpop.permute.xlu1 %260  ;;  %v310_v26 = vpop.permute.xlu0 %309 }
  0xe5   : > { %v263_v27 = vsel %vm262_vm3, %v259_v17, %v261_v25  ;;  %v312_v28 = vsel %vm311_vm1, %v308_v10, %v310_v26 }
  0xe6   : > { %v272_v29 = vsel %vm242_vm4, %v263_v27, 0.0  ;;  %v317_v30 = vsel %vm242_vm4, %v312_v28, 0.0 }
  0xe7   : > { %274 = vst [vmem:[#allocation2 + $0x8] sm:$0xf] %v272_v29  ;;  %v321_v31 = vrot.slane %v317_v30, 4 }
  0xe8   : > { %v293_v32 = vpop.permute.xlu1 %292  ;;  %v291_v33 = vpop.permute.xlu0 %290 }
  0xe9   : > { %325 = vst [vmem:[#allocation2 + $0x18] sm:$0xf0] %v321_v31  ;;  %v295_v34 = vsel %vm294_vm5, %v291_v33, %v293_v32  ;;  %v298_v35 = vsel %vm294_vm5, 0.0, %v291_v33 }
  0xea   : > { %v303_v36 = vsel %vm251_vm6, %v298_v35, 0.0  ;;  %v304_v37 = vsel %vm252_vm7, %v295_v34, 0.0  ;;  %v390_v50 = vld [vmem:[#allocation2] sm:$0xff] }
  0xeb   : > { %305 = vst [vmem:[#allocation2 + $0x10] sm:$0xf] %v303_v36  ;;  %306 = vst [vmem:[#allocation2 + $0x18] sm:$0xf] %v304_v37 }
  0xec   : > { %v330_v38 = vpop.permute.xlu1 %329  ;;  %v332_v39 = vpop.permute.xlu0 %331 }
  0xed   : > { %v334_v40 = vsel %vm333_vm8, %v330_v38, %v332_v39  ;;  %v337_v41 = vsel %vm333_vm8, %v332_v39, 0.0 }
  0xee   : > { %v338_v42 = vsel %vm251_vm6, %v334_v40, 0.0  ;;  %v339_v43 = vsel %vm252_vm7, %v337_v41, 0.0  ;;  %v391_v53 = vld [vmem:[#allocation2 + $0x8] sm:$0xff] }
  0xef   : > { %v342_v44 = vrot.slane %v338_v42, 4  ;;  %v343_v45 = vrot.slane %v339_v43, 4 }
  0xf0   : > { %v351_v46 = vpop.permute.xlu1 %350  ;;  %v364_v47 = vpop.permute.xlu0 %363 }
  0xf1   : > { %346 = vst [vmem:[#allocation2 + $0x20] sm:$0xf0] %v342_v44  ;;  %347 = vst [vmem:[#allocation2 + $0x28] sm:$0xf0] %v343_v45  ;;  %v356_v48 = vsel %vm352_vm9, %v351_v46, 0.0  ;;  %v368_v49 = vsel %vm365_vm10, %v364_v47, 0.0 }
  0xf2   : > { %v358_v51 = vsel %vm242_vm4, %v356_v48, 0.0  ;;  %v371_v52 = vrot.slane %v368_v49, 4  ;;  %v393_v54 = vld [vmem:[#allocation2 + $0x18] sm:$0xff]  ;;  %v392_v55 = vld [vmem:[#allocation2 + $0x10] sm:$0xff] }
  0xf3   : > { %360 = vst [vmem:[#allocation2 + $0x38] sm:$0xf] %v358_v51  ;;  %v867_v56 = vpack.c.bf16 %v393_v54, %v391_v53  ;;  %v869_v57 = vpack.c.bf16 %v392_v55, %v390_v50 }
  0xf4   : > { %375 = vst [vmem:[#allocation2 + $0x38] sm:$0xf0] %v371_v52  ;;  %v349_v58 = vpop.permute.xlu1 %348  ;;  %v362_v59 = vpop.permute.xlu0 %361 }
  0xf5   : > { %v353_v60 = vsel %vm352_vm9, %v349_v58, %v351_v46  ;;  %v366_v61 = vsel %vm365_vm10, %v362_v59, %v364_v47  ;;  %868 = vmatprep.subr.bf16.mxu0 %v867_v56 }
  0xf6   : > { %v357_v62 = vsel %vm241_vm2, %v353_v60, 0.0  ;;  %v370_v63 = vrot.slane %v366_v61, 4  ;;  %870 = vmatpush1.bf16.msra.mxu0 %v869_v57 }
  0xf7   : > { %359 = vst [vmem:[#allocation2 + $0x30] sm:$0xf] %v357_v62 }
  0xf8   : > { %374 = vst [vmem:[#allocation2 + $0x30] sm:$0xf0] %v370_v63  ;;  %v377_v0 = vpop.permute.xlu1 %376  ;;  %v379_v1 = vpop.permute.xlu0 %378  ;;  %v395_v7 = vld [vmem:[#allocation2 + $0x28] sm:$0xff]  ;;  %v394_v10 = vld [vmem:[#allocation2 + $0x20] sm:$0xff] }
  0xf9   : > { %v381_v2 = vsel %vm380_vm11, %v377_v0, %v379_v1  ;;  %v384_v3 = vsel %vm380_vm11, %v379_v1, 0.0 }
  0xfa   : > { %v385_v4 = vsel %vm251_vm6, %v381_v2, 0.0  ;;  %v386_v5 = vsel %vm252_vm7, %v384_v3, 0.0 }
  0xfb   : > { %387 = vst [vmem:[#allocation2 + $0x40] sm:$0xf] %v385_v4  ;;  %388 = vst [vmem:[#allocation2 + $0x48] sm:$0xf] %v386_v5  ;;  %v397_v8 = vld [vmem:[#allocation2 + $0x38] sm:$0xff] }
  0xfc   : > { %v871_v9 = vpack.c.bf16 %v397_v8, %v395_v7 }
  0xfe   : > { %872 = vmatprep.subr.bf16.mxu0 %v871_v9 }
  0xff   : > { %v396_v11 = vld [vmem:[#allocation2 + $0x30] sm:$0xff] }
 0x100   : > { %v873_v12 = vpack.c.bf16 %v396_v11, %v394_v10 }
 0x102   : > { %874 = vmatpush1.bf16.msra.mxu0 %v873_v12  ;;  %v399_v13 = vld [vmem:[#allocation2 + $0x48] sm:$0xf]  ;;  %v398_v14 = vld [vmem:[#allocation2 + $0x40] sm:$0xf] }
 0x103   : > { %841 = vmatprep.subr.msk.mxu0 %vm404_vm12, %v399_v13 }
 0x106   : > { %842 = vmatpush1.msk.msra.mxu0 %vm404_vm12, %v398_v14  ;;  %vm854_vm12 = vmneg %vm279_vm0 }
 0x107   : > { %843 = vmatmul.mubr.msk.f32.vlgmr.msra.gmra.mrb[0].mxu0 %vm400_vm13, %v389_v15  ;;  %vm1186_vm13 = vmmov 1  }
 0x1da   : > { %v477_v17 = vpop.f32.mrb[0].mxu0 }
 0x1db   : > { %v479_v18 = vpop.f32.mrb[1].mxu0  ;;  %v486_v19 = vmul.f32 %v477_v17, %v477_v17 }
 0x1dc   : > { %v487_v20 = vmul.f32 %v479_v18, %v479_v18  ;;  %v482_v21 = vadd.f32 %v479_v18, %v477_v17 }
 0x1de   : > { %483 = vadd.xlane.f32.xlu0 %v482_v21  ;;  %v488_v22 = vadd.f32 %v487_v20, %v486_v19 }
 0x1e0   : > { %489 = vadd.xlane.f32.xlu1 %v488_v22 }
 0x26b   : > { %v484_v25 = vpop.xlane.xlu0 %483 }
 0x26c   : > { %v485_v26 = vmul.f32 0.00390625, %v484_v25 }
 0x26d   : > { %v490_v27 = vpop.xlane.xlu1 %489 }
 0x26e   : > { %v491_v28 = vmul.f32 0.00390625, %v490_v27  ;;  %v492_v29 = vmul.f32 %v485_v26, %v485_v26  ;;  %v495_v33 = vsub.f32 %v477_v17, %v485_v26  ;;  %v496_v34 = vsub.f32 %v479_v18, %v485_v26 }
 0x270   : > { %v493_v30 = vsub.f32 %v491_v28, %v492_v29 }
 0x272   : > { %v494_v31 = vmax.f32 %v493_v30, 0.0 }
 0x274   : > { %v497_v32 = vadd.f32 1e-05, %v494_v31 }
 0x276   : > { %1012 = vrsqrt.f32 %v497_v32 }
 0x280   : > { %v1013_v35 = vpop.eup %1012 }
 0x281   : > { %v499_v36 = vmul.f32 %v1013_v35, %v495_v33  ;;  %v500_v37 = vmul.f32 %v1013_v35, %v496_v34 }
 0x283   : > { %vm501_vm14 = vcmp.ge.f32.partialorder %v499_v36, 0.0  ;;  %vm502_vm15 = vcmp.ge.f32.partialorder %v500_v37, 0.0  ;;  %v503_v38 = vmul.f32 0.01, %v499_v36  ;;  %v504_v39 = vmul.f32 0.01, %v500_v37 }
 0x285   : > { %v1453_v40 = vsel %vm501_vm14, %v499_v36, %v503_v38  ;;  %v506_v41 = vsel %vm502_vm15, %v500_v37, %v504_v39  ;;  %vm876_vm14 = vmpackc.low %vm1186_vm13, %vm242_vm4 }
 0x286   : > { %v981_v42 = vpack.i.bf16 %v506_v41, %v1453_v40  ;;  %v1001_v43 = vpack.i.bf16 %v1453_v40, %v506_v41  ;;  %vm879_vm15 = vmpackc.low %vm854_vm12, %vm241_vm2 }
 0x287   : > { %vm897_vm12 = vmpackc.low %vm1186_vm13, %vm241_vm2 }
 0x288   : > { %982 = vrot.lane.b32.xlu1 %v981_v42, %s1177_s20  ;;  %977 = vrot.lane.b32.xlu0 %v981_v42, %s1179_s21  ;;  %s1106_s20 = sshll.u32 %s1187_s30, 4  ;;  %s1107_s20 = int_to_ptr.vmem [resolvable:$false] %s1106_s20 }
 0x289   : > { %p1109_p8 = scmp.lt.s32.totalorder %s1519_s9, %s1107_s20 }
 0x28c   : > { %992 = vrot.lane.b32.xlu1 %v981_v42, %s1178_s24  ;;  %987 = vrot.lane.b32.xlu0 %v981_v42, %s1180_s18  ;;  %s1108_s24 = scalar_lea.vmem %s1107_s20, 512 }
 0x28d   : > { %p1110_p12 = scmp.lt.s32.totalorder %s1108_s24, %s1102_s29 }
 0x28f   : > { %p1111_p3 = por %p1110_p12, %p1109_p8 }
 0x290   : > { %1002 = vrot.lane.b32.xlu1 %v1001_v43, %s1182_s28  ;;  %997 = vrot.lane.b32.xlu0 %v1001_v43, %s1181_s23 }
 0x291   : > { %p1112_p7 = pnand %p1111_p3, %p1105_p4 }
 0x294   : > { %593 = vrot.lane.b32.xlu1 %v506_v41, %s1184_s4  ;;  %1007 = vrot.lane.b32.xlu0 %v981_v42, %s1183_s22 }
 0x298   : > { %591 = vrot.lane.b32.xlu0 %v1453_v40, %s1184_s4 }
 0x2fa   : > { %v983_v44 = vpop.permute.xlu1 %982  ;;  %v978_v45 = vpop.permute.xlu0 %977 }
 0x2fb   : > { %v985_v46 = vunpack.i.h.bf16 %v983_v44  ;;  %v984_v47 = vunpack.i.l.bf16 %v983_v44  ;;  %v980_v48 = vunpack.i.h.bf16 %v978_v45  ;;  %v979_v49 = vunpack.i.l.bf16 %v978_v45 }
 0x2fd   : > { %v516_v50 = vsel %vm262_vm3, 0.0, %v979_v49  ;;  %v513_v51 = vsel %vm262_vm3, %v979_v49, %v980_v48  ;;  %v525_v52 = vsel %vm279_vm0, %v984_v47, %v985_v46  ;;  %vm882_vm0 = vmpackc.low %vm242_vm4, %vm252_vm7 }
 0x2fe   : > { %v993_v53 = vpop.permute.xlu1 %992  ;;  %v988_v54 = vpop.permute.xlu0 %987  ;;  %v875_v55 = vpack.c.bf16 %v525_v52, %v513_v51  ;;  %v878_v56 = vpack.c.bf16 %v984_v47, %v516_v50  ;;  %vm885_vm3 = vmpackc.low %vm241_vm2, %vm251_vm6 }
 0x2ff   : > { %v995_v57 = vunpack.i.h.bf16 %v993_v53  ;;  %v994_v58 = vunpack.i.l.bf16 %v993_v53  ;;  %v990_v59 = vunpack.i.h.bf16 %v988_v54  ;;  %v989_v60 = vunpack.i.l.bf16 %v988_v54 }
 0x300   : > { %877 = vmatprep.subr.msk.bf16.mxu1 %vm876_vm14, %v875_v55 }
 0x301   : > { %v547_v61 = vsel %vm311_vm1, %v994_v58, %v995_v57  ;;  %v550_v62 = vsel %vm311_vm1, 0.0, %v994_v58  ;;  %v535_v63 = vsel %vm294_vm5, %v989_v60, %v990_v59  ;;  %v538_v0 = vsel %vm294_vm5, 0.0, %v989_v60  ;;  %880 = vmatpush1.bf16.msk.msra.mxu1 %vm879_vm15, %v878_v56  ;;  %vm888_vm1 = vmpackc.low %vm252_vm7, %vm1186_vm13 }
 0x302   : > { %v881_v1 = vpack.c.bf16 %v547_v61, %v535_v63  ;;  %v884_v2 = vpack.c.bf16 %v550_v62, %v538_v0  ;;  %v1003_v3 = vpop.permute.xlu1 %1002  ;;  %v998_v4 = vpop.permute.xlu0 %997  ;;  %vm891_vm5 = vmpackc.low %vm251_vm6, %vm1186_vm13 }
 0x303   : > { %v1000_v5 = vunpack.i.h.bf16 %v998_v4  ;;  %v999_v7 = vunpack.i.l.bf16 %v998_v4  ;;  %v1004_v8 = vunpack.i.l.bf16 %v1003_v3  ;;  %v1005_v9 = vunpack.i.h.bf16 %v1003_v3 }
 0x304   : > { %883 = vmatprep.subr.msk.bf16.mxu1 %vm882_vm0, %v881_v1 }
 0x305   : > { %v561_v10 = vsel %vm333_vm8, %v1000_v5, %v999_v7  ;;  %v564_v11 = vsel %vm333_vm8, %v999_v7, 0.0  ;;  %886 = vmatpush1.bf16.msk.msra.mxu1 %vm885_vm3, %v884_v2  ;;  %v576_v18 = vsel %vm352_vm9, %v1004_v8, 0.0  ;;  %vm894_vm8 = vmpackc.low %vm365_vm10, %vm242_vm4  ;;  %v573_v19 = vsel %vm352_vm9, %v1005_v9, %v1004_v8 }
 0x306   : > { %v887_v12 = vpack.c.bf16 %v564_v11, %v506_v41  ;;  %v890_v13 = vpack.c.bf16 %v561_v10, %v1453_v40  ;;  %v1008_v14 = vpop.permute.xlu0 %1007  ;;  %v594_v22 = vpop.permute.xlu1 %593  ;;  %vm622_vm4 = vcmask 588800  }
 0x307   : > { %v1010_v15 = vunpack.i.h.bf16 %v1008_v14  ;;  %v1009_v17 = vunpack.i.l.bf16 %v1008_v14  ;;  %v598_v26 = vsel %vm380_vm11, %v594_v22, 0.0 }
 0x308   : > { %889 = vmatprep.subr.msk.bf16.mxu1 %vm888_vm1, %v887_v12 }
 0x309   : > { %v893_v20 = vpack.c.bf16 %v1010_v15, %v576_v18  ;;  %v585_v21 = vsel %vm365_vm10, %v1009_v17, %v1010_v15  ;;  %892 = vmatpush1.bf16.msk.msra.mxu1 %vm891_vm5, %v890_v13 }
 0x30a   : > { %v896_v25 = vpack.c.bf16 %v585_v21, %v573_v19  ;;  %v592_v27 = vpop.permute.xlu0 %591 }
 0x30b   : > { %895 = vmatprep.subr.msk.bf16.mxu1 %vm894_vm8, %v893_v20  ;;  %v595_v28 = vsel %vm380_vm11, %v592_v27, %v594_v22 }
 0x30d   : > { %898 = vmatpush1.bf16.msk.msra.mxu1 %vm897_vm12, %v896_v25 }
 0x30e   : > { %865 = vmatprep.subr.msk.mxu1 %vm252_vm7, %v598_v26 }
 0x311   : > { %866 = vmatpush1.msk.msra.mxu1 %vm251_vm6, %v595_v28 }
 0x312   : > { %844 = vmatmul.mubr.msk.f32.vlgmr.msra.gmra.mrb[0].mxu1 %vm622_vm4, %v603_v16 }
 0x3e5   : > { %v692_v29 = vpop.f32.mrb[0].mxu1 }
 0x3e6   : > { %v694_v6 = vpop.f32.mrb[1].mxu1  ;;  %v701_v30 = vmul.f32 %v692_v29, %v692_v29 }
 0x3e7   : > { %v702_v31 = vmul.f32 %v694_v6, %v694_v6  ;;  %v697_v32 = vadd.f32 %v694_v6, %v692_v29 }
 0x3e9   : > { %698 = vadd.xlane.f32.xlu1 %v697_v32  ;;  %v703_v33 = vadd.f32 %v702_v31, %v701_v30 }
 0x3eb   : > { %704 = vadd.xlane.f32.xlu0 %v703_v33 }
 0x476   : > { %v699_v24 = vpop.xlane.xlu1 %698 }
 0x477   : > { %v700_v34 = vmul.f32 0.00390625, %v699_v24 }
 0x478   : > { %v705_v35 = vpop.xlane.xlu0 %704 }
 0x479   : > { %v706_v36 = vmul.f32 0.00390625, %v705_v35  ;;  %v707_v37 = vmul.f32 %v700_v34, %v700_v34  ;;  %v710_v40 = vsub.f32 %v692_v29, %v700_v34  ;;  %v711_v41 = vsub.f32 %v694_v6, %v700_v34 }
 0x47b   : > { %v708_v38 = vsub.f32 %v706_v36, %v707_v37 }
 0x47d   : > { %v709_v39 = vmax.f32 %v708_v38, 0.0 }
 0x47f   : > { %v712_v23 = vadd.f32 1e-05, %v709_v39 }
 0x481   : > { %1014 = vrsqrt.f32 %v712_v23 }
 0x48b   : > { %v1015_v42 = vpop.eup %1014 }
 0x48c   : > { %v714_v43 = vmul.f32 %v1015_v42, %v710_v40  ;;  %v715_v44 = vmul.f32 %v1015_v42, %v711_v41 }
 0x48e   : > { %vm716_vm2 = vcmp.ge.f32.partialorder %v714_v43, 0.0  ;;  %vm717_vm6 = vcmp.ge.f32.partialorder %v715_v44, 0.0  ;;  %v718_v45 = vmul.f32 0.01, %v714_v43  ;;  %v719_v46 = vmul.f32 0.01, %v715_v44 }
 0x490   : > { %v720_v47 = vsel %vm716_vm2, %v714_v43, %v718_v45  ;;  %v721_v48 = vsel %vm717_vm6, %v715_v44, %v719_v46 }
 0x491   : > { %722 = vst [vmem:[%s211_s8] sm:$0xff] %v720_v47  ;;  %723 = vst [vmem:[%s211_s8 + $0x8] sm:$0xff] %v721_v48 }
 0x492   : > { %1115 = shalt.err (!%p1112_p7)
}
 0x493   : > { %s1116_s17 = scalar_lea.hbm %s1517_s27, 256  ;;  %s1120_s23 = scalar_lea.hbm %s1564_s3, 512 }
 0x494   : > { %p1117_p10 = scmp.ne.s32.totalorder %s1517_s27, %s1116_s17  ;;  %p1121_p0 = scmp.lt.u32.totalorder %s1517_s27, %s1564_s3 }
 0x495   : > { %p1122_p9 = scmp.lt.u32.totalorder %s1120_s23, %s1116_s17  ;;  %p1124_p2 = scmp.lt.u32.totalorder %s1116_s17, %s1517_s27 }
 0x496   : > { %p1118_p13 = pnand %p1117_p10, %p1327_p6 }
 0x497   : > { %p1123_p11 = por %p1122_p9, %p1121_p0 }
 0x498   : > { %p1119_p5 = pneg %p1118_p13 }
 0x499   : > { %p1125_p1 = por %p1124_p2, %p1123_p11 }
 0x49b   : > { %p1126_p4 = pnand %p1125_p1, %p1119_p5 }
 0x49d   : > { %1129 = shalt.err (!%p1126_p4)
}
 0x49e   : > { %909 = dma.vmem_to_hbm [thread:$0]  (%p1327_p6), %s1519_s9, 256, %s1517_s27, %s725_s16  }
 0x49f PF: > { %s751_s4 = sand.u32 1, %s1160_s12   ;;  %p1579_p8 = scmp.ne.s32.totalorder %s1569_s19, 0 }
 0x4a0   : > { %p1580_p12 = scmp.ge.s32.totalorder %s1172_s15, 2  ;;  %s752_s5 = scalar_lea.sflag [#allocation6], %s751_s4 }
 0x4a2   : > { %p923_p3 = pnand %p1580_p12, %p1579_p8 }
 0x4a4   : > { %1155 = dma.done.wait (!%p923_p3), %s752_s5, 256  }
 0x4a5   : > { %1157 = vsyncadd (!%p923_p3), %s752_s5, 4294967040  ;;  %p17_p7 = scmp.ge.s32.totalorder %s1264_s26, 4   ;;  %s1581_s12 = smov %s1164_s13 }
 0x4a6   : > { %s1582_s13 = smov %s1168_s14  ;;  %s1583_s14 = smov %s1323_s25 }
 0x4a7   : > { %s1584_s15 = smov %s1264_s26  ;;  %19 = sbr.rel (!%p17_p7) target bundleno = 6 (0x6), region = 85 }
 0x4ae   :  { %757 = vsyncpa [#allocation5], 1 }
 0x4af   :  { %759 = vsyncpa [#allocation5 + $0x1], 1 }
 0x4b0   :  { %760 = vsyncpa [#allocation8], 1 }
 0x4b1   :  { %761 = vsyncpa [#allocation6], 1 }
 0x4b2   :  { %763 = vsyncpa [#allocation6 + $0x1], 1 }

</bundles_post_ra>
